<compile_context>
chip_gen: v5e
topology: v5e:2x2
jax: 0.10.0
libtpu: 0.0.40
codegen_flags: <defaults>
</compile_context>

<pallas_src>
import functools

import jax
import jax.numpy as jnp
import numpy as np
from jax.experimental import pallas as pl
from jax.experimental.pallas import tpu as pltpu


_TARGET_BLOCK_BYTES = 4 << 20      # per-input DMA block size target
_MAX_ROW_TILE = 8192
_F32_TEMPS = 6                     # full-width f32 intermediates budgeted per row


@functools.lru_cache(maxsize=1)
def _chip_config():
    """Return (vmem_limit_bytes, vmem_budget_bytes, num_tensorcores)."""
    is_v7 = False
    try:
        kind = jax.devices()[0].device_kind.lower()
        is_v7 = "v7" in kind
    except Exception:
        pass
    vmem_phys = None
    try:
        vmem_phys = int(pltpu.get_tpu_info().vmem_capacity_bytes)
    except Exception:
        pass
    if vmem_phys is None:
        vmem_phys = (64 << 20) if is_v7 else (128 << 20)

    if is_v7 or vmem_phys <= (64 << 20):
        # v7x-class: 64 MiB physical VMEM per TC, 2 TensorCores per chip.
        vmem_limit = min(48 << 20, (vmem_phys * 3) // 4)
        return vmem_limit, (vmem_limit * 5) // 6, 2
    # v5e / v6e: 128 MiB physical VMEM, single TensorCore.
    vmem_limit = min(100 << 20, (vmem_phys * 3) // 4)          # 96 MiB on 128 MiB chips
    return vmem_limit, (vmem_limit * 5) // 6, 1


def _pick_row_tile(n_rows, n_cols, itemsize, vmem_budget):
    """Largest row tile whose buffers + f32 temps fit the budget (bytes-based)."""
    # 2 inputs x 2 pipeline buffers at input dtype + full-width f32 compute temps.
    per_row_vmem = 2 * 2 * n_cols * itemsize + _F32_TEMPS * n_cols * 4
    cap_vmem = vmem_budget // per_row_vmem
    cap_tgt = _TARGET_BLOCK_BYTES // (n_cols * itemsize)
    cap = int(min(_MAX_ROW_TILE, cap_vmem, cap_tgt))
    cap = max(8, (cap // 8) * 8)
    if n_rows <= cap:
        # Single full-dim block (exempt from the 8-row divisibility rule).
        return int(n_rows)
    return cap                                          # multiple of 8; last block partial


def _kd_loss_kernel(s_ref, t_ref, out_ref, acc_ref, *,
                    inv_T, final_scale, n_rows, row_tile, tiles_per_part):
    p = pl.program_id(0)     # partition (megacore split on v7x)
    i = pl.program_id(1)     # row-tile index within partition

    @pl.when(i == 0)
    def _():
        acc_ref[...] = jnp.zeros_like(acc_ref)

    # Global (unclamped) row range of this logical tile; padded / redundant rows
    # are masked at the per-row result so they contribute exactly zero.  No
    # full-tile input masking is needed: every reduction below is per-row, so
    # garbage in padded rows only corrupts those rows' per_row values, and the
    # select does not propagate NaN.
    tile_idx = p * tiles_per_part + i
    row0 = tile_idx * row_tile
    row_ids = row0 + jax.lax.broadcasted_iota(jnp.int32, (row_tile, 1), 0)
    valid = row_ids < n_rows

    s = s_ref[...].astype(jnp.float32) * inv_T   # s/T
    t = t_ref[...].astype(jnp.float32) * inv_T   # t/T

    # Row-wise softmax stats (lane reductions).
    s_max = jnp.max(s, axis=-1, keepdims=True)
    s_sum = jnp.sum(jnp.exp(s - s_max), axis=-1, keepdims=True)

    t_max = jnp.max(t, axis=-1, keepdims=True)
    t_exp = jnp.exp(t - t_max)
    t_sum = jnp.sum(t_exp, axis=-1, keepdims=True)

    # KL per row using  log p_t - log p_s = (t - s) + (s_lse - t_lse):
    #   per_row = (sum_c t_exp*(t-s)) / t_sum + (s_max - t_max) + log(s_sum / t_sum)
    # One full-tile subtract, one weighted lane-reduce, and only one exact
    # reciprocal + one log on the lane-sparse (row_tile, 1) column.
    wsum = jnp.sum(t_exp * (t - s), axis=-1, keepdims=True)
    inv = 1.0 / t_sum                                   # exact: feeds a log
    const = (s_max - t_max) + jnp.log(s_sum * inv)
    per_row = jnp.where(valid, wsum * inv + const, 0.0)

    # Scalar accumulator: in-register tree sum, no lane-sparse vst/vld per step.
    acc_ref[...] += jnp.sum(per_row, keepdims=True)

    @pl.when(i == pl.num_programs(1) - 1)
    def _():
        # Scale folds batchmean, T^2 and kd_weight.
        out_ref[...] = (acc_ref[...] * final_scale).astype(out_ref.dtype)


def kd_loss(s_out, t_out, kd_weight=1.0, T=1.0, row_tile=None):
    """Pallas KDLoss.forward. s_out/t_out: [N, C] logits (f32 or bf16). Scalar f32.

    bf16 logits stream half the HBM bytes (near-2x on mem-bound v5e/v6e paths);
    internal math is always f32.
    """
    assert s_out.shape == t_out.shape and s_out.ndim == 2
    N, C = s_out.shape
    vmem_limit, vmem_budget, num_tc = _chip_config()
    if row_tile is None:
        row_tile = _pick_row_tile(N, C, jnp.dtype(s_out.dtype).itemsize, vmem_budget)

    tiles_total = pl.cdiv(N, row_tile)
    # Shard the batch reduction across both TensorCores only on v7x-class chips;
    # on single-TC v5e/v6e a size-2 "parallel" axis is just a serial loop with a
    # redundant masked tail tile, so keep a single partition there.
    num_parts = 2 if (num_tc >= 2 and tiles_total >= 2) else 1
    tiles_per_part = pl.cdiv(tiles_total, num_parts)

    kernel = functools.partial(
        _kd_loss_kernel,
        inv_T=float(1.0 / T),
        final_scale=float(T * T * kd_weight / N),
        n_rows=N,
        row_tile=row_tile,
        tiles_per_part=tiles_per_part,
    )

    def in_map(p, i):
        # Redundant tail tiles (when tiles don't split evenly across partitions)
        # are clamped onto the last real tile and fully masked inside the kernel.
        return (jnp.minimum(p * tiles_per_part + i, tiles_total - 1), 0)

    out = pl.pallas_call(
        kernel,
        out_shape=jax.ShapeDtypeStruct((num_parts, 1), jnp.float32),
        grid_spec=pltpu.PrefetchScalarGridSpec(
            num_scalar_prefetch=0,
            grid=(num_parts, tiles_per_part),
            in_specs=[
                pl.BlockSpec((row_tile, C), in_map),
                pl.BlockSpec((row_tile, C), in_map),
            ],
            out_specs=pl.BlockSpec((1, 1), lambda p, i: (p, 0)),
            scratch_shapes=[pltpu.VMEM((1, 1), jnp.float32)],
        ),
        compiler_params=pltpu.CompilerParams(
            dimension_semantics=("parallel", "arbitrary"),
            vmem_limit_bytes=vmem_limit,
        ),
    )(s_out, t_out)
    return jnp.sum(out)


def kd_loss_ref(s_out, t_out, kd_weight=1.0, T=1.0):
    """Pure-JAX reference mirroring the PyTorch module."""
    s = s_out.astype(jnp.float32)
    t = t_out.astype(jnp.float32)
    log_p_s = jax.nn.log_softmax(s / T, axis=1)
    p_t = jax.nn.softmax(t / T, axis=1)
    log_p_t = jax.nn.log_softmax(t / T, axis=1)
    kl = jnp.sum(p_t * (log_p_t - log_p_s)) / s.shape[0]
    return kl * T * T * kd_weight


if __name__ == "__main__":
    T = 2.0
    kd_weight = 1.5

    key = jax.random.PRNGKey(0)
    k_s, k_t, k_s2, k_t2 = jax.random.split(key, 4)

    # Case 1: small classification-style logits, single full block.
    N, C = 16, 128
    s_out = jax.random.normal(k_s, (N, C), dtype=jnp.float32)
    t_out = jax.random.normal(k_t, (N, C), dtype=jnp.float32)
    loss = jax.block_until_ready(kd_loss(s_out, t_out, kd_weight=kd_weight, T=T))
    ref = kd_loss_ref(s_out, t_out, kd_weight=kd_weight, T=T)
    np.testing.assert_allclose(np.asarray(loss), np.asarray(ref), rtol=1e-5, atol=1e-5)

    # Case 2: non-divisible batch + forced small tile -> exercises the cdiv grid,
    # partial-block masking, and (on v7x) the 2-way parallel partition path.
    N2, C2 = 100, 128
    s2 = jax.random.normal(k_s2, (N2, C2), dtype=jnp.float32)
    t2 = jax.random.normal(k_t2, (N2, C2), dtype=jnp.float32)
    loss2 = jax.block_until_ready(kd_loss(s2, t2, kd_weight=kd_weight, T=T, row_tile=32))
    ref2 = kd_loss_ref(s2, t2, kd_weight=kd_weight, T=T)
    np.testing.assert_allclose(np.asarray(loss2), np.asarray(ref2), rtol=1e-5, atol=1e-5)

    # Case 3: bf16 inputs stream half the HBM bytes; kernel upcasts to f32 internally.
    s_bf, t_bf = s_out.astype(jnp.bfloat16), t_out.astype(jnp.bfloat16)
    loss3 = jax.block_until_ready(kd_loss(s_bf, t_bf, kd_weight=kd_weight, T=T))
    ref3 = kd_loss_ref(s_bf, t_bf, kd_weight=kd_weight, T=T)
    np.testing.assert_allclose(np.asarray(loss3), np.asarray(ref3), rtol=1e-5, atol=1e-5)

    print("KERNEL_OK")
</pallas_src>

<mosaic_0001>
module attributes {stable_mosaic.version = 11 : i64} {
  func.func @_kd_loss_kernel(%arg0: i32, %arg1: i32, %arg2: memref<16x128xf32, #tpu.memory_space<vmem>>, %arg3: memref<16x128xf32, #tpu.memory_space<vmem>>, %arg4: memref<1x1xf32, #tpu.memory_space<vmem>>, %arg5: memref<1x1xf32, #tpu.memory_space<vmem>>) attributes {dimension_semantics = [#tpu.dimension_semantics<parallel>, #tpu.dimension_semantics<arbitrary>], iteration_bounds = array<i64: 1, 1>, scalar_prefetch = 0 : i64, scratch_operands = 1 : i64, tpu.core_type = #tpu.core_type<tc>, window_params = [{transform_indices = @transform_0, window_bounds = array<i64: 16, 128>}, {transform_indices = @transform_1, window_bounds = array<i64: 16, 128>}, {transform_indices = @transform_2, window_bounds = array<i64: 1, 1>}]} {
    %c0_i32 = arith.constant 0 : i32
    %0 = arith.cmpi eq, %arg1, %c0_i32 : i32
    %1 = arith.extui %0 : i1 to i32
    %c0_i32_0 = arith.constant 0 : i32
    %2 = arith.cmpi ne, %1, %c0_i32_0 : i32
    scf.if %2 {
      %cst_20 = arith.constant 0.000000e+00 : f32
      %56 = vector.broadcast %cst_20 : f32 to vector<1x1xf32>
      %c0_21 = arith.constant 0 : index
      %c0_22 = arith.constant 0 : index
      %57 = vector.load %arg5[%c0_21, %c0_22] : memref<1x1xf32, #tpu.memory_space<vmem>>, vector<1x1xf32>
      tpu.vector_store %arg5[%c0_21, %c0_22], %56 {strides = array<i32>} : memref<1x1xf32, #tpu.memory_space<vmem>>, vector<1x1xf32>,
    } else {
    }
    %c1_i32 = arith.constant 1 : i32
    %3 = arith.muli %arg0, %c1_i32 : i32
    %4 = arith.addi %3, %arg1 : i32
    %c16_i32 = arith.constant 16 : i32
    %5 = arith.muli %4, %c16_i32 : i32
    %6 = tpu.iota {dimensions = array<i32: 0>} : vector<16x1xi32>
    %7 = vector.broadcast %5 : i32 to vector<16x1xi32>
    %8 = arith.addi %7, %6 : vector<16x1xi32>
    %c16_i32_1 = arith.constant 16 : i32
    %9 = vector.broadcast %c16_i32_1 : i32 to vector<16x1xi32>
    %10 = arith.cmpi slt, %8, %9 : vector<16x1xi32>
    %c0 = arith.constant 0 : index
    %c0_2 = arith.constant 0 : index
    %11 = vector.load %arg2[%c0, %c0_2] : memref<16x128xf32, #tpu.memory_space<vmem>>, vector<16x128xf32>
    %cst = arith.constant 5.000000e-01 : f32
    %12 = vector.broadcast %cst : f32 to vector<16x128xf32>
    %13 = arith.mulf %11, %12 : vector<16x128xf32>
    %c0_3 = arith.constant 0 : index
    %c0_4 = arith.constant 0 : index
    %14 = vector.load %arg3[%c0_3, %c0_4] : memref<16x128xf32, #tpu.memory_space<vmem>>, vector<16x128xf32>
    %cst_5 = arith.constant 5.000000e-01 : f32
    %15 = vector.broadcast %cst_5 : f32 to vector<16x128xf32>
    %16 = arith.mulf %14, %15 : vector<16x128xf32>
    %cst_6 = arith.constant dense<0xFF800000> : vector<16xf32>
    %17 = vector.multi_reduction <maximumf>, %13, %cst_6 [1] : vector<16x128xf32> to vector<16xf32>
    %18 = vector.shape_cast %17 : vector<16xf32> to vector<16x1xf32>
    %19 = vector.broadcast %18 : vector<16x1xf32> to vector<16x128xf32>
    %20 = arith.subf %13, %19 : vector<16x128xf32>
    %21 = math.exp %20 : vector<16x128xf32>
    %cst_7 = arith.constant dense<0.000000e+00> : vector<16xf32>
    %22 = vector.multi_reduction <add>, %21, %cst_7 [1] : vector<16x128xf32> to vector<16xf32>
    %23 = vector.shape_cast %22 : vector<16xf32> to vector<16x1xf32>
    %cst_8 = arith.constant dense<0xFF800000> : vector<16xf32>
    %24 = vector.multi_reduction <maximumf>, %16, %cst_8 [1] : vector<16x128xf32> to vector<16xf32>
    %25 = vector.shape_cast %24 : vector<16xf32> to vector<16x1xf32>
    %26 = vector.broadcast %25 : vector<16x1xf32> to vector<16x128xf32>
    %27 = arith.subf %16, %26 : vector<16x128xf32>
    %28 = math.exp %27 : vector<16x128xf32>
    %cst_9 = arith.constant dense<0.000000e+00> : vector<16xf32>
    %29 = vector.multi_reduction <add>, %28, %cst_9 [1] : vector<16x128xf32> to vector<16xf32>
    %30 = vector.shape_cast %29 : vector<16xf32> to vector<16x1xf32>
    %31 = arith.subf %16, %13 : vector<16x128xf32>
    %32 = arith.mulf %28, %31 : vector<16x128xf32>
    %cst_10 = arith.constant dense<0.000000e+00> : vector<16xf32>
    %33 = vector.multi_reduction <add>, %32, %cst_10 [1] : vector<16x128xf32> to vector<16xf32>
    %34 = vector.shape_cast %33 : vector<16xf32> to vector<16x1xf32>
    %cst_11 = arith.constant 1.000000e+00 : f32
    %35 = vector.broadcast %cst_11 : f32 to vector<16x1xf32>
    %36 = arith.divf %35, %30 : vector<16x1xf32>
    %37 = arith.subf %18, %25 : vector<16x1xf32>
    %38 = arith.mulf %23, %36 : vector<16x1xf32>
    %39 = math.log %38 : vector<16x1xf32>
    %40 = arith.addf %37, %39 : vector<16x1xf32>
    %41 = arith.mulf %34, %36 : vector<16x1xf32>
    %42 = arith.addf %41, %40 : vector<16x1xf32>
    %cst_12 = arith.constant 0.000000e+00 : f32
    %43 = vector.broadcast %cst_12 : f32 to vector<16x1xf32>
    %44 = arith.select %10, %42, %43 : vector<16x1xi1>, vector<16x1xf32>
    %c0_13 = arith.constant 0 : index
    %c0_14 = arith.constant 0 : index
    %45 = vector.load %arg5[%c0_13, %c0_14] : memref<1x1xf32, #tpu.memory_space<vmem>>, vector<1x1xf32>
    %46 = vector.shape_cast %44 : vector<16x1xf32> to vector<1x16x1xf32>
    %cst_15 = arith.constant dense<0.000000e+00> : vector<1xf32>
    %47 = vector.multi_reduction <add>, %46, %cst_15 [1, 2] : vector<1x16x1xf32> to vector<1xf32>
    %48 = vector.shape_cast %47 : vector<1xf32> to vector<1x1x1xf32>
    %49 = vector.extract %48[0, 0, 0] : f32 from vector<1x1x1xf32>
    %50 = vector.broadcast %49 : f32 to vector<1x1xf32>
    %51 = arith.addf %45, %50 : vector<1x1xf32>
    %c0_16 = arith.constant 0 : index
    %c0_17 = arith.constant 0 : index
    %52 = vector.load %arg5[%c0_16, %c0_17] : memref<1x1xf32, #tpu.memory_space<vmem>>, vector<1x1xf32>
    tpu.vector_store %arg5[%c0_16, %c0_17], %51 {strides = array<i32>} : memref<1x1xf32, #tpu.memory_space<vmem>>, vector<1x1xf32>,
    %c0_i32_18 = arith.constant 0 : i32
    %53 = arith.cmpi eq, %arg1, %c0_i32_18 : i32
    %54 = arith.extui %53 : i1 to i32
    %c0_i32_19 = arith.constant 0 : i32
    %55 = arith.cmpi ne, %54, %c0_i32_19 : i32
    scf.if %55 {
      %c0_20 = arith.constant 0 : index
      %c0_21 = arith.constant 0 : index
      %56 = vector.load %arg5[%c0_20, %c0_21] : memref<1x1xf32, #tpu.memory_space<vmem>>, vector<1x1xf32>
      %cst_22 = arith.constant 3.750000e-01 : f32
      %57 = vector.broadcast %cst_22 : f32 to vector<1x1xf32>
      %58 = arith.mulf %56, %57 : vector<1x1xf32>
      %c0_23 = arith.constant 0 : index
      %c0_24 = arith.constant 0 : index
      %59 = vector.load %arg4[%c0_23, %c0_24] : memref<1x1xf32, #tpu.memory_space<vmem>>, vector<1x1xf32>
      tpu.vector_store %arg4[%c0_23, %c0_24], %58 {strides = array<i32>} : memref<1x1xf32, #tpu.memory_space<vmem>>, vector<1x1xf32>,
    } else {
    }
    return
  }
  func.func @transform_0(%arg0: i32, %arg1: i32) -> (i32, i32) {
    %c1_i32 = arith.constant 1 : i32
    %0 = arith.muli %arg0, %c1_i32 : i32
    %1 = arith.addi %0, %arg1 : i32
    %c0_i32 = arith.constant 0 : i32
    %2 = arith.minsi %1, %c0_i32 : i32
    %c0_i32_0 = arith.constant 0 : i32
    %c0_i32_1 = arith.constant 0 : i32
    return %2, %c0_i32_0 : i32, i32
  }
  func.func @transform_1(%arg0: i32, %arg1: i32) -> (i32, i32) {
    %c1_i32 = arith.constant 1 : i32
    %0 = arith.muli %arg0, %c1_i32 : i32
    %1 = arith.addi %0, %arg1 : i32
    %c0_i32 = arith.constant 0 : i32
    %2 = arith.minsi %1, %c0_i32 : i32
    %c0_i32_0 = arith.constant 0 : i32
    %c0_i32_1 = arith.constant 0 : i32
    return %2, %c0_i32_0 : i32, i32
  }
  func.func @transform_2(%arg0: i32, %arg1: i32) -> (i32, i32) {
    %c0_i32 = arith.constant 0 : i32
    %c0_i32_0 = arith.constant 0 : i32
    return %arg0, %c0_i32 : i32, i32
  }
}

</mosaic_0001>

<bundles_post_ra>
// kernel: tpu_custom_call.1
= control target key start
LH: loop header
LB: loop body
LE: loop exit
PB: predicated region body
PF: predicated region fallthrough
CT: control target
= control target key end

     0   :  { %7 = vsyncpa [#allocation4], 0  ;;  %s370_s0 = inlined_call_operand.hbm [shape: f32[16,128], index: 0, kind: input, shape index: {}]   ;;  %s371_s1 = inlined_call_operand.hbm [shape: f32[16,128], index: 1, kind: input, shape index: {}]   ;;  %s372_s2 = inlined_call_operand.hbm [shape: f32[1,1], index: 2, kind: output, shape index: {}]  }
   0x1   :  { %8 = vsyncpa [#allocation7], 0 }
   0x2   :  { %9 = vsyncpa [#allocation5], 0  ;;  %s20_s11 = sshll.u32 %s370_s0, 4  ;;  %s318_s12 = smov [#allocation3]   ;;  %s21_s11 = int_to_ptr.hbm [resolvable:$true] %s20_s11 }
   0x3   :  { %s22_s13 = sshll.u32 %s318_s12, 4  ;;  %s39_s16 = sshll.u32 %s371_s1, 4  ;;  %s23_s13 = int_to_ptr.vmem [resolvable:$true] %s22_s13  ;;  %s40_s16 = int_to_ptr.hbm [resolvable:$true] %s39_s16 }
   0x4   :  { %s319_s17 = smov 128   ;;  %s320_s18 = smov 8  }
   0x5   :  { %28 = dma.hbm_to_vmem [thread:$0]  %s21_s11, 256, %s23_s13, [#allocation4], %s319_s17, %s319_s17, %s320_s18  }
   0x6   :  { %s321_s19 = smov [#allocation6]  }
   0x7   :  { %s41_s20 = sshll.u32 %s321_s19, 4  ;;  %s42_s20 = int_to_ptr.vmem [resolvable:$true] %s41_s20 }
   0x8   :  { %47 = dma.hbm_to_vmem [thread:$0]  %s40_s16, 256, %s42_s20, [#allocation7], %s319_s17, %s319_s17, %s320_s18  }
   0x9   :  { %312 = dma.done.wait [#allocation4], 256  }
   0xa   :  { %313 = vsyncadd [#allocation4], 4294967040 }
   0xb   :  { %314 = dma.done.wait [#allocation7], 256  }
   0xc   :  { %315 = vsyncadd [#allocation7], 4294967040  ;;  %v84_v0 = vld [vmem:[#allocation6] sm:$0xff]  ;;  %v80_v1 = vld [vmem:[#allocation3] sm:$0xff]  ;;  %vm171_vm8 = vcmask 7168   ;;  %vm68_vm9 = vcmask 0  }
   0xd   :  { %v86_v2 = vmul.f32 0.5, %v84_v0  ;;  %v82_v3 = vmul.f32 0.5, %v80_v1  ;;  %v85_v4 = vld [vmem:[#allocation6 + $0x8] sm:$0xff]  ;;  %v81_v5 = vld [vmem:[#allocation3 + $0x8] sm:$0xff]  ;;  %s323_s1 = smov [#allocation8]   ;;  %s201_s24 = sshll.u32 %s372_s2, 4  ;;  %s202_s24 = int_to_ptr.hbm [resolvable:$true] %s201_s24 }
   0xe   :  { %v87_v6 = vmul.f32 0.5, %v85_v4  ;;  %v83_v7 = vmul.f32 0.5, %v81_v5  ;;  %s199_s21 = sshll.u32 %s323_s1, 4  ;;  %s200_s21 = int_to_ptr.vmem [resolvable:$true] %s199_s21 }
   0xf   :  { %102 = vmax.xlane.f32.xlu0 %v86_v2  ;;  %88 = vmax.xlane.f32.xlu1 %v82_v3  ;;  %v116_v27 = vsub.f32 %v86_v2, %v82_v3 }
  0x10   :  { %v117_v23 = vsub.f32 %v87_v6, %v83_v7 }
  0x17   :  { %104 = vmax.xlane.f32.xlu0 %v87_v6  ;;  %90 = vmax.xlane.f32.xlu1 %v83_v7 }
  0x82   :  { %v345_v8 = vpop.xlane.xlu0 %102  ;;  %v347_v9 = vpop.xlane.xlu1 %88 }
  0x83   :  { %v106_v10 = vsub.f32 %v86_v2, %v345_v8  ;;  %v92_v11 = vsub.f32 %v82_v3, %v347_v9  ;;  %v154_v12 = vsub.f32 %v347_v9, %v345_v8 }
  0x85   :  { %v108_v13 = vmul.f32 1.442695, %v106_v10  ;;  %v94_v14 = vmul.f32 1.442695, %v92_v11 }
  0x87   :  { %224 = vpow2.f32 %v108_v13 }
  0x88   :  { %226 = vpow2.f32 %v94_v14 }
  0x8a   :  { %v353_v15 = vpop.xlane.xlu0 %104  ;;  %v355_v16 = vpop.xlane.xlu1 %90 }
  0x8b   :  { %v107_v17 = vsub.f32 %v87_v6, %v353_v15  ;;  %v93_v18 = vsub.f32 %v83_v7, %v355_v16  ;;  %v155_v60 = vsub.f32 %v355_v16, %v353_v15  ;;  %v322_v7 = vmov 0.0  }
  0x8c   :  { %69 = vst.msk [vmem:[#allocation2] sm:$0x1] %vm68_vm9, %v322_v7 }
  0x8d   :  { %v225_v19 = vpop.eup %224  ;;  %v110_v20 = vmul.f32 1.442695, %v107_v17  ;;  %v96_v21 = vmul.f32 1.442695, %v93_v18 }
  0x8e   :  { %v227_v22 = vpop.eup %226  ;;  %112 = vadd.xlane.f32.xlu2 %v225_v19  ;;  %v118_v28 = vmul.f32 %v225_v19, %v116_v27 }
  0x8f   :  { %228 = vpow2.f32 %v110_v20  ;;  %98 = vadd.xlane.f32.xlu0 %v227_v22 }
  0x90   :  { %230 = vpow2.f32 %v96_v21 }
  0x93   :  { %v170_v15 = vld [vmem:[#allocation2] sm:$0x1] }
  0x95   :  { %v229_v24 = vpop.eup %228 }
  0x96   :  { %v231_v25 = vpop.eup %230  ;;  %114 = vadd.xlane.f32.xlu2 %v229_v24  ;;  %v119_v26 = vmul.f32 %v229_v24, %v117_v23 }
  0x97   :  { %100 = vadd.xlane.f32.xlu1 %v231_v25 }
  0x98   :  { %122 = vadd.xlane.f32.xlu0 %v119_v26 }
  0x9e   :  { %120 = vadd.xlane.f32.xlu2 %v118_v28 }
 0x101   :  { %v113_v29 = vpop.xlane.xlu2 %112 }
 0x102   :  { %232 = vrcp.f32 %v113_v29  ;;  %v135_v34 = vand.u32 2147483648, %v113_v29  ;;  %v133_v36 = vand.u32 2147483647, %v113_v29  ;;  %vm129_vm1 = vweird.f32 %v113_v29  ;;  %v99_v43 = vpop.xlane.xlu0 %98 }
 0x104   :  { %v136_v39 = vor.u32 1.1754944e-38, %v135_v34  ;;  %vm134_vm3 = vcmp.eq.f32.partialorder %v133_v36, 8.507059e+37 }
 0x108   :  { %v233_v30 = vpop.eup %232 }
 0x109   :  { %v125_v31 = vmul.f32 %v233_v30, %v113_v29  ;;  %v115_v32 = vpop.xlane.xlu2 %114  ;;  %vm130_vm0 = vweird.f32 %v233_v30 }
 0x10a   :  { %234 = vrcp.f32 %v115_v32  ;;  %vm131_vm2 = vmor %vm129_vm1, %vm130_vm0  ;;  %v150_v46 = vand.u32 2147483648, %v115_v32  ;;  %v148_v48 = vand.u32 2147483647, %v115_v32  ;;  %vm144_vm5 = vweird.f32 %v115_v32  ;;  %v101_v51 = vpop.xlane.xlu1 %100 }
 0x10b   :  { %v126_v33 = vsub.f32 1.0, %v125_v31  ;;  %v123_v63 = vpop.xlane.xlu0 %122 }
 0x10c   :  { %v151_v50 = vor.u32 1.1754944e-38, %v150_v46  ;;  %vm149_vm7 = vcmp.eq.f32.partialorder %v148_v48, 8.507059e+37 }
 0x10d   :  { %v127_v35 = vmul.f32 %v233_v30, %v126_v33 }
 0x10f   :  { %v128_v37 = vadd.f32 %v233_v30, %v127_v35 }
 0x110   :  { %v235_v38 = vpop.eup %234 }
 0x111   :  { %v132_v40 = vsel %vm131_vm2, %v233_v30, %v128_v37  ;;  %v140_v41 = vmul.f32 %v235_v38, %v115_v32  ;;  %vm145_vm4 = vweird.f32 %v235_v38  ;;  %v121_v57 = vpop.xlane.xlu2 %120 }
 0x112   :  { %v137_v42 = vsel %vm134_vm3, %v136_v39, %v132_v40  ;;  %vm146_vm6 = vmor %vm144_vm5, %vm145_vm4 }
 0x113   :  { %v156_v44 = vmul.f32 %v137_v42, %v99_v43  ;;  %v141_v45 = vsub.f32 1.0, %v140_v41  ;;  %v164_v61 = vmul.f32 %v137_v42, %v121_v57 }
 0x115   :  { %236 = vlog2.f32 %v156_v44  ;;  %v142_v47 = vmul.f32 %v235_v38, %v141_v45 }
 0x117   :  { %v143_v49 = vadd.f32 %v235_v38, %v142_v47 }
 0x119   :  { %v147_v52 = vsel %vm146_vm6, %v235_v38, %v143_v49 }
 0x11a   :  { %v152_v53 = vsel %vm149_vm7, %v151_v50, %v147_v52 }
 0x11b   :  { %v237_v54 = vpop.eup %236  ;;  %v157_v55 = vmul.f32 %v152_v53, %v101_v51  ;;  %v165_v0 = vmul.f32 %v152_v53, %v123_v63 }
 0x11c   :  { %v159_v56 = vmul.f32 0.6931472, %v237_v54 }
 0x11d   :  { %238 = vlog2.f32 %v157_v55 }
 0x11e   :  { %v162_v58 = vadd.f32 %v159_v56, %v154_v12 }
 0x120   :  { %v166_v1 = vadd.f32 %v164_v61, %v162_v58 }
 0x122   :  { %v172_v4 = vsel %vm171_vm8, %v166_v1, 0.0 }
 0x123   :  { %v239_v59 = vpop.eup %238 }
 0x124   :  { %v161_v62 = vmul.f32 0.6931472, %v239_v59 }
 0x126   :  { %v163_v2 = vadd.f32 %v161_v62, %v155_v60 }
 0x128   :  { %v167_v3 = vadd.f32 %v165_v0, %v163_v2 }
 0x12a   :  { %v173_v5 = vsel %vm171_vm8, %v167_v3, 0.0 }
 0x12b   :  { %v174_v6 = vadd.f32 %v173_v5, %v172_v4 }
 0x12d   :  { %175 = vadd.xlane.f32.xlu1 %v174_v6 }
 0x1a0   :  { %v176_v8 = vpop.xlane.xlu1 %175 }
 0x1a1   :  { %v177_v9 = vrot.slane %v176_v8, 4 }
 0x1a3   :  { %v178_v10 = vadd.f32 %v177_v9, %v176_v8 }
 0x1a5   :  { %v179_v11 = vrot.slane %v178_v10, 2 }
 0x1a7   :  { %v180_v12 = vadd.f32 %v179_v11, %v178_v10 }
 0x1a9   :  { %v181_v13 = vrot.slane %v180_v12, 1 }
 0x1ab   :  { %v182_v14 = vadd.f32 %v181_v13, %v180_v12 }
 0x1ad   :  { %216 = vpush %v182_v14 }
 0x1de   :  { %s217_s0 = spop %216 }
 0x1df   :  { %v184_v16 = vstv %s217_s0 }
 0x1e0   :  { %v185_v17 = vadd.f32 %v184_v16, %v170_v15 }
 0x1e2   :  { %187 = vst.msk [vmem:[#allocation2] sm:$0x1] %vm68_vm9, %v185_v17 }
 0x1e9   :  { %v191_v18 = vld [vmem:[#allocation2] sm:$0x1] }
 0x1ea   :  { %v192_v19 = vmul.f32 0.375, %v191_v18 }
 0x1ec   :  { %193 = vst.msk [vmem:[#allocation8] sm:$0x1] %vm68_vm9, %v192_v19 }
 0x1ed   :  { %204 = dma.vmem_to_hbm [thread:$0]  %s200_s21, 16, %s202_s24, [#allocation5]  }
 0x1ee   :  { %316 = dma.done.wait [#allocation5], 16  }
 0x1ef   :  { %317 = vsyncadd [#allocation5], 4294967280 }
 0x1f0   :  { %209 = vsyncpa [#allocation4], 1 }
 0x1f1   :  { %210 = vsyncpa [#allocation7], 1 }
 0x1f2   :  { %211 = vsyncpa [#allocation5], 1 }

</bundles_post_ra>
